<compile_context>
chip_gen: v6e
topology: v6e:2x2x1
jax: 0.10.0
libtpu: 0.0.40
codegen_flags: <defaults>
</compile_context>

<pallas_src>
import functools

import numpy as np
import jax
import jax.numpy as jnp
from jax import lax
from jax.experimental import pallas as pl
from jax.experimental.pallas import tpu as pltpu


def _up_kernel(x1_lo_ref, x1_hi_ref, frac_ref, x2_ref, w_ref, gamma_ref,
               beta_ref, out_ref, xpad_ref, *, B, L, C1, C2, K, eps):
    """Fused 2-tap upsample + concat + conv1d + batchnorm(batch stats) + relu.

    x1_lo_ref : (B, L, C1)     bf16  x1 rows gathered at floor(src)
    x1_hi_ref : (B, L, C1)     bf16  x1 rows gathered at floor(src)+1 (clamped)
    frac_ref  : (L, 1)         f32   per-output-row lerp weight
    x2_ref    : (B, L, C2)     bf16  skip connection (NLC)
    w_ref     : (K, Cin, Cout) bf16  per-tap conv weight, Cin order = cat([x2, x1])
    gamma_ref : (1, Cout)      f32   BN scale
    beta_ref  : (1, Cout)      f32   BN shift
    out_ref   : (B*L, Cout)    f32   output (NLC rows, flattened over batch)
    xpad_ref  : (B, L+2P, Cin) bf16  VMEM scratch: conv-padded concat operand
    """
    Cin = C1 + C2
    P = K // 2
    Cout = w_ref.shape[2]

    # 1) Zero the scratch once (only the 2*P border rows per batch need it,
    #    but the buffer is tiny and this keeps the data stores unconditional).
    xpad_ref[...] = jnp.zeros_like(xpad_ref)

    # 2) Linear upsample (align_corners=True) as a 2-tap lerp on the VPU.
    #    Lerp math in f32 (no bf16 VPU on v5e); result stored bf16 for the MXU.
    f = frac_ref[...]                                    # (L, 1) -> bcast
    lo = x1_lo_ref[...].astype(jnp.float32)
    hi = x1_hi_ref[...].astype(jnp.float32)
    x1u = (lo + (hi - lo) * f).astype(jnp.bfloat16)      # (B, L, C1)

    # 3) Write the channel-concatenated operand into the padded scratch rows
    #    [P:P+L); channel order [x2 | x1u] matches torch.cat([x2, x1], dim=1).
    xpad_ref[:, P:P + L, 0:C2] = x2_ref[...]
    xpad_ref[:, P:P + L, C2:Cin] = x1u

    # 4) Conv1d(padding=K//2, bias=False) as K accumulating MXU matmuls over
    #    sublane-shifted tap views of the scratch (bf16 operands, f32 acc).
    acc = jnp.zeros((B * L, Cout), jnp.float32)
    for k in range(K):                                   # K static & small
        tap = xpad_ref[:, k:k + L, :].reshape(B * L, Cin)     # (B*L, Cin) bf16
        acc = acc + jnp.dot(tap, w_ref[k],
                            preferred_element_type=jnp.float32)

    # 5) BatchNorm1d with batch statistics (training mode): one pass of
    #    per-channel sum/sumsq in f32, biased variance, then affine + ReLU.
    n = float(B * L)
    s = jnp.sum(acc, axis=0, keepdims=True)              # (1, Cout)
    ss = jnp.sum(acc * acc, axis=0, keepdims=True)       # (1, Cout)
    mean = s * (1.0 / n)
    var = jnp.maximum(ss * (1.0 / n) - mean * mean, 0.0)
    scale = gamma_ref[...] * lax.rsqrt(var + eps)         # (1, Cout)
    shift = beta_ref[...] - mean * scale
    out_ref[...] = jnp.maximum(acc * scale + shift, 0.0).astype(out_ref.dtype)


def _interp_indices(lin, lout):
    """nn.Upsample(mode='linear', align_corners=True) as gather indices + frac."""
    if lout == 1:
        return (np.zeros(1, np.int32), np.zeros(1, np.int32),
                np.zeros((1, 1), np.float32))
    src = np.arange(lout) * (lin - 1) / (lout - 1)
    i0 = np.clip(np.floor(src).astype(np.int32), 0, lin - 1)
    i1 = np.minimum(i0 + 1, lin - 1)
    frac = (src - i0).astype(np.float32).reshape(lout, 1)
    return i0, i1, frac


def up_forward(x1_ncl, x2_ncl, weight, gamma, beta, *, kernel_size,
               scale_factor=2, eps=1e-5):
    """Up.forward. x1_ncl: (B,C1,Lin), x2_ncl: (B,C2,L), weight: (Cout, C2+C1, K)."""
    assert kernel_size % 2 == 1, "padding=K//2 is 'same' only for odd K"
    B, C1, Lin = x1_ncl.shape
    _, C2, L = x2_ncl.shape
    Cout, Cin, K = weight.shape
    assert Cin == C1 + C2 and K == kernel_size
    # diff = x2.size(2) - upsampled x1.size(2) must be 0 (module asserts this)
    assert L == Lin * scale_factor

    i0, i1, frac = _interp_indices(Lin, L)

    # Layout prep (NCL -> NLC) + bf16 casts for the MXU operands.
    x1_nlc = jnp.transpose(x1_ncl, (0, 2, 1))                     # (B, Lin, C1)
    x1_lo = x1_nlc[:, i0, :].astype(jnp.bfloat16)                 # (B, L, C1)
    x1_hi = x1_nlc[:, i1, :].astype(jnp.bfloat16)                 # (B, L, C1)
    x2 = jnp.transpose(x2_ncl, (0, 2, 1)).astype(jnp.bfloat16)    # (B, L, C2)
    # weight OIH (Cout, Cin, K) -> per-tap (K, Cin, Cout)
    w_taps = jnp.transpose(weight, (2, 1, 0)).astype(jnp.bfloat16)
    gamma2 = gamma.reshape(1, Cout).astype(jnp.float32)
    beta2 = beta.reshape(1, Cout).astype(jnp.float32)
    frac_j = jnp.asarray(frac)                                     # (L, 1) f32

    kernel = functools.partial(_up_kernel, B=B, L=L, C1=C1, C2=C2, K=K, eps=eps)

    flops = 2 * B * L * K * Cin * Cout + 4 * B * L * C1 + 8 * B * L * Cout
    bytes_accessed = (
        (x1_lo.size + x1_hi.size + x2.size + w_taps.size) * 2     # bf16 inputs
        + (frac_j.size + gamma2.size + beta2.size) * 4            # f32 inputs
        + B * L * Cout * 4)                                        # f32 output

    out_flat = pl.pallas_call(
        kernel,
        out_shape=jax.ShapeDtypeStruct((B * L, Cout), jnp.float32),
        in_specs=[pl.BlockSpec(memory_space=pltpu.MemorySpace.VMEM)] * 7,
        out_specs=pl.BlockSpec(memory_space=pltpu.MemorySpace.VMEM),
        scratch_shapes=[
            pltpu.VMEM((B, L + 2 * (K // 2), Cin), jnp.bfloat16)],
        compiler_params=pltpu.CompilerParams(
            vmem_limit_bytes=32 * 1024 * 1024),
        cost_estimate=pl.CostEstimate(flops=flops, transcendentals=Cout,
                                      bytes_accessed=bytes_accessed),
    )(x1_lo, x1_hi, frac_j, x2, w_taps, gamma2, beta2)

    out_nlc = out_flat.reshape(B, L, Cout)                         # (B, L, Cout)
    return jnp.transpose(out_nlc, (0, 2, 1))                       # (B, Cout, L)


def up_forward_ref(x1, x2, weight, gamma, beta, *, kernel_size, scale_factor=2,
                   eps=1e-5):
    """Pure-JAX f32 reference (NCL layout, mirrors the PyTorch module)."""
    B, C1, Lin = x1.shape
    Lout = Lin * scale_factor
    i0, i1, frac = _interp_indices(Lin, Lout)
    frac = jnp.asarray(frac.reshape(Lout))
    x1u = x1[:, :, i0] * (1.0 - frac) + x1[:, :, i1] * frac
    x = jnp.concatenate([x2, x1u], axis=1)
    y = lax.conv_general_dilated(
        x, weight, window_strides=(1,),
        padding=[(kernel_size // 2, kernel_size // 2)],
        dimension_numbers=("NCH", "OIH", "NCH"))
    mean = y.mean(axis=(0, 2), keepdims=True)
    var = ((y - mean) ** 2).mean(axis=(0, 2), keepdims=True)
    yhat = (y - mean) * lax.rsqrt(var + eps)
    yhat = yhat * gamma[None, :, None] + beta[None, :, None]
    return jnp.maximum(yhat, 0.0)


if __name__ == "__main__":
    key = jax.random.PRNGKey(0)
    k1, k2, k3, k4, k5 = jax.random.split(key, 5)

    # Up(in_channels=16, out_channels=8, kernel_size=3, scale_factor=2)
    B, C1, C2, Lin, K, Cout, scale = 2, 8, 8, 8, 3, 8, 2
    L = Lin * scale

    x1 = jax.random.normal(k1, (B, C1, Lin), jnp.float32)        # low-res input
    x2 = jax.random.normal(k2, (B, C2, L), jnp.float32)          # skip connection
    weight = 0.2 * jax.random.normal(k3, (Cout, C1 + C2, K), jnp.float32)
    gamma = 1.0 + 0.1 * jax.random.normal(k4, (Cout,), jnp.float32)
    beta = 0.1 * jax.random.normal(k5, (Cout,), jnp.float32)

    out = up_forward(x1, x2, weight, gamma, beta, kernel_size=K,
                     scale_factor=scale)
    out = jax.block_until_ready(out)
    assert out.shape == (B, Cout, L)

    ref = up_forward_ref(x1, x2, weight, gamma, beta, kernel_size=K,
                         scale_factor=scale)
    # Tolerance loosened vs the all-f32 version: MXU operands are bf16 now
    # (per perf review); stats/normalize stay f32.
    if not jnp.allclose(out, ref, atol=2e-2, rtol=2e-2):
        max_err = float(jnp.max(jnp.abs(out - ref)))
        raise AssertionError(f"kernel/reference mismatch, max abs err {max_err}")

    print("KERNEL_OK")
</pallas_src>

<mosaic_0001>
module attributes {stable_mosaic.version = 11 : i64} {
  func.func @_up_kernel(%arg0: memref<2x16x8xbf16, #tpu.memory_space<vmem>>, %arg1: memref<2x16x8xbf16, #tpu.memory_space<vmem>>, %arg2: memref<16x1xf32, #tpu.memory_space<vmem>>, %arg3: memref<2x16x8xbf16, #tpu.memory_space<vmem>>, %arg4: memref<3x16x8xbf16, #tpu.memory_space<vmem>>, %arg5: memref<1x8xf32, #tpu.memory_space<vmem>>, %arg6: memref<1x8xf32, #tpu.memory_space<vmem>>, %arg7: memref<32x8xf32, #tpu.memory_space<vmem>>, %arg8: memref<2x18x16xbf16, #tpu.memory_space<vmem>>) attributes {dimension_semantics = [], scalar_prefetch = 0 : i64, scratch_operands = 1 : i64, tpu.core_type = #tpu.core_type<tc>} {
    %cst = arith.constant 0.000000e+00 : bf16
    %0 = vector.broadcast %cst : bf16 to vector<2x18x16xbf16>
    %c0 = arith.constant 0 : index
    %c0_0 = arith.constant 0 : index
    %c0_1 = arith.constant 0 : index
    %1 = vector.load %arg8[%c0, %c0_0, %c0_1] : memref<2x18x16xbf16, #tpu.memory_space<vmem>>, vector<2x18x16xbf16>
    tpu.vector_store %arg8[%c0, %c0_0, %c0_1], %0 {strides = array<i32>} : memref<2x18x16xbf16, #tpu.memory_space<vmem>>, vector<2x18x16xbf16>,
    %c0_2 = arith.constant 0 : index
    %c0_3 = arith.constant 0 : index
    %2 = vector.load %arg2[%c0_2, %c0_3] : memref<16x1xf32, #tpu.memory_space<vmem>>, vector<16x1xf32>
    %c0_4 = arith.constant 0 : index
    %c0_5 = arith.constant 0 : index
    %c0_6 = arith.constant 0 : index
    %3 = vector.load %arg0[%c0_4, %c0_5, %c0_6] : memref<2x16x8xbf16, #tpu.memory_space<vmem>>, vector<2x16x8xbf16>
    %4 = arith.extf %3 : vector<2x16x8xbf16> to vector<2x16x8xf32>
    %c0_7 = arith.constant 0 : index
    %c0_8 = arith.constant 0 : index
    %c0_9 = arith.constant 0 : index
    %5 = vector.load %arg1[%c0_7, %c0_8, %c0_9] : memref<2x16x8xbf16, #tpu.memory_space<vmem>>, vector<2x16x8xbf16>
    %6 = arith.extf %5 : vector<2x16x8xbf16> to vector<2x16x8xf32>
    %7 = arith.subf %6, %4 : vector<2x16x8xf32>
    %8 = vector.shape_cast %2 : vector<16x1xf32> to vector<1x16x1xf32>
    %9 = vector.broadcast %8 : vector<1x16x1xf32> to vector<2x16x8xf32>
    %10 = arith.mulf %7, %9 : vector<2x16x8xf32>
    %11 = arith.addf %4, %10 : vector<2x16x8xf32>
    %12 = arith.truncf %11 : vector<2x16x8xf32> to vector<2x16x8xbf16>
    %c0_10 = arith.constant 0 : index
    %c0_11 = arith.constant 0 : index
    %c0_12 = arith.constant 0 : index
    %13 = vector.load %arg3[%c0_10, %c0_11, %c0_12] : memref<2x16x8xbf16, #tpu.memory_space<vmem>>, vector<2x16x8xbf16>
    %c0_13 = arith.constant 0 : index
    %c1 = arith.constant 1 : index
    %c0_14 = arith.constant 0 : index
    %14 = vector.load %arg8[%c0_13, %c1, %c0_14] : memref<2x18x16xbf16, #tpu.memory_space<vmem>>, vector<2x16x8xbf16>
    tpu.vector_store %arg8[%c0_13, %c1, %c0_14], %13 {strides = array<i32>} : memref<2x18x16xbf16, #tpu.memory_space<vmem>>, vector<2x16x8xbf16>,
    %c0_15 = arith.constant 0 : index
    %c1_16 = arith.constant 1 : index
    %c8 = arith.constant 8 : index
    %15 = vector.load %arg8[%c0_15, %c1_16, %c8] : memref<2x18x16xbf16, #tpu.memory_space<vmem>>, vector<2x16x8xbf16>
    tpu.vector_store %arg8[%c0_15, %c1_16, %c8], %12 {strides = array<i32>} : memref<2x18x16xbf16, #tpu.memory_space<vmem>>, vector<2x16x8xbf16>,
    %cst_17 = arith.constant 0.000000e+00 : f32
    %16 = vector.broadcast %cst_17 : f32 to vector<32x8xf32>
    %c0_18 = arith.constant 0 : index
    %c0_19 = arith.constant 0 : index
    %c0_20 = arith.constant 0 : index
    %17 = vector.load %arg8[%c0_18, %c0_19, %c0_20] : memref<2x18x16xbf16, #tpu.memory_space<vmem>>, vector<2x16x16xbf16>
    %18 = vector.shape_cast %17 : vector<2x16x16xbf16> to vector<32x16xbf16>
    %c0_21 = arith.constant 0 : index
    %c0_22 = arith.constant 0 : index
    %c0_23 = arith.constant 0 : index
    %19 = vector.load %arg4[%c0_21, %c0_22, %c0_23] : memref<3x16x8xbf16, #tpu.memory_space<vmem>>, vector<1x16x8xbf16>
    %20 = vector.shape_cast %19 : vector<1x16x8xbf16> to vector<16x8xbf16>
    %cst_24 = arith.constant dense<0.000000e+00> : vector<32x8xf32>
    %21 = tpu.matmul %18, %20, %cst_24 {dimension_numbers = #tpu.dot_dimension_numbers<[1], [0], [0], [1], [0, 0, 1, 1], [], []>} : vector<32x16xbf16>, vector<16x8xbf16>, vector<32x8xf32> -> vector<32x8xf32>
    %22 = arith.addf %16, %21 : vector<32x8xf32>
    %c0_25 = arith.constant 0 : index
    %c1_26 = arith.constant 1 : index
    %c0_27 = arith.constant 0 : index
    %23 = vector.load %arg8[%c0_25, %c1_26, %c0_27] : memref<2x18x16xbf16, #tpu.memory_space<vmem>>, vector<2x16x16xbf16>
    %24 = vector.shape_cast %23 : vector<2x16x16xbf16> to vector<32x16xbf16>
    %c1_28 = arith.constant 1 : index
    %c0_29 = arith.constant 0 : index
    %c0_30 = arith.constant 0 : index
    %25 = vector.load %arg4[%c1_28, %c0_29, %c0_30] : memref<3x16x8xbf16, #tpu.memory_space<vmem>>, vector<1x16x8xbf16>
    %26 = vector.shape_cast %25 : vector<1x16x8xbf16> to vector<16x8xbf16>
    %cst_31 = arith.constant dense<0.000000e+00> : vector<32x8xf32>
    %27 = tpu.matmul %24, %26, %cst_31 {dimension_numbers = #tpu.dot_dimension_numbers<[1], [0], [0], [1], [0, 0, 1, 1], [], []>} : vector<32x16xbf16>, vector<16x8xbf16>, vector<32x8xf32> -> vector<32x8xf32>
    %28 = arith.addf %22, %27 : vector<32x8xf32>
    %c0_32 = arith.constant 0 : index
    %c2 = arith.constant 2 : index
    %c0_33 = arith.constant 0 : index
    %29 = vector.load %arg8[%c0_32, %c2, %c0_33] : memref<2x18x16xbf16, #tpu.memory_space<vmem>>, vector<2x16x16xbf16>
    %30 = vector.shape_cast %29 : vector<2x16x16xbf16> to vector<32x16xbf16>
    %c2_34 = arith.constant 2 : index
    %c0_35 = arith.constant 0 : index
    %c0_36 = arith.constant 0 : index
    %31 = vector.load %arg4[%c2_34, %c0_35, %c0_36] : memref<3x16x8xbf16, #tpu.memory_space<vmem>>, vector<1x16x8xbf16>
    %32 = vector.shape_cast %31 : vector<1x16x8xbf16> to vector<16x8xbf16>
    %cst_37 = arith.constant dense<0.000000e+00> : vector<32x8xf32>
    %33 = tpu.matmul %30, %32, %cst_37 {dimension_numbers = #tpu.dot_dimension_numbers<[1], [0], [0], [1], [0, 0, 1, 1], [], []>} : vector<32x16xbf16>, vector<16x8xbf16>, vector<32x8xf32> -> vector<32x8xf32>
    %34 = arith.addf %28, %33 : vector<32x8xf32>
    %cst_38 = arith.constant dense<0.000000e+00> : vector<8xf32>
    %35 = vector.multi_reduction <add>, %34, %cst_38 [0] : vector<32x8xf32> to vector<8xf32>
    %36 = vector.shape_cast %35 : vector<8xf32> to vector<1x8xf32>
    %37 = arith.mulf %34, %34 : vector<32x8xf32>
    %cst_39 = arith.constant dense<0.000000e+00> : vector<8xf32>
    %38 = vector.multi_reduction <add>, %37, %cst_39 [0] : vector<32x8xf32> to vector<8xf32>
    %39 = vector.shape_cast %38 : vector<8xf32> to vector<1x8xf32>
    %cst_40 = arith.constant 3.125000e-02 : f32
    %40 = vector.broadcast %cst_40 : f32 to vector<1x8xf32>
    %41 = arith.mulf %36, %40 : vector<1x8xf32>
    %cst_41 = arith.constant 3.125000e-02 : f32
    %42 = vector.broadcast %cst_41 : f32 to vector<1x8xf32>
    %43 = arith.mulf %39, %42 : vector<1x8xf32>
    %44 = arith.mulf %41, %41 : vector<1x8xf32>
    %45 = arith.subf %43, %44 : vector<1x8xf32>
    %cst_42 = arith.constant 0.000000e+00 : f32
    %46 = vector.broadcast %cst_42 : f32 to vector<1x8xf32>
    %47 = arith.maximumf %45, %46 : vector<1x8xf32>
    %c0_43 = arith.constant 0 : index
    %c0_44 = arith.constant 0 : index
    %48 = vector.load %arg5[%c0_43, %c0_44] : memref<1x8xf32, #tpu.memory_space<vmem>>, vector<1x8xf32>
    %cst_45 = arith.constant 9.99999974E-6 : f32
    %49 = vector.broadcast %cst_45 : f32 to vector<1x8xf32>
    %50 = arith.addf %47, %49 : vector<1x8xf32>
    %51 = math.rsqrt %50 : vector<1x8xf32>
    %52 = arith.mulf %48, %51 : vector<1x8xf32>
    %c0_46 = arith.constant 0 : index
    %c0_47 = arith.constant 0 : index
    %53 = vector.load %arg6[%c0_46, %c0_47] : memref<1x8xf32, #tpu.memory_space<vmem>>, vector<1x8xf32>
    %54 = arith.mulf %41, %52 : vector<1x8xf32>
    %55 = arith.subf %53, %54 : vector<1x8xf32>
    %56 = vector.broadcast %52 : vector<1x8xf32> to vector<32x8xf32>
    %57 = arith.mulf %34, %56 : vector<32x8xf32>
    %58 = vector.broadcast %55 : vector<1x8xf32> to vector<32x8xf32>
    %59 = arith.addf %57, %58 : vector<32x8xf32>
    %cst_48 = arith.constant 0.000000e+00 : f32
    %60 = vector.broadcast %cst_48 : f32 to vector<32x8xf32>
    %61 = arith.maximumf %59, %60 : vector<32x8xf32>
    %c0_49 = arith.constant 0 : index
    %c0_50 = arith.constant 0 : index
    %62 = vector.load %arg7[%c0_49, %c0_50] : memref<32x8xf32, #tpu.memory_space<vmem>>, vector<32x8xf32>
    tpu.vector_store %arg7[%c0_49, %c0_50], %61 {strides = array<i32>} : memref<32x8xf32, #tpu.memory_space<vmem>>, vector<32x8xf32>,
    return
  }
}

</mosaic_0001>

<bundles_post_ra>
// kernel: tpu_custom_call.1
= control target key start
LH: loop header
LB: loop body
LE: loop exit
PB: predicated region body
PF: predicated region fallthrough
CT: control target
= control target key end

     0   :  { %v682_v0 = vmov 0   ;;  %vm27_vm0 = vcmask 125952   ;;  %vm124_vm1 = vcmask 60416   ;;  %vm125_vm2 = vsmask.f32 7938  ;;  %s871_s2 = inlined_call_operand.vmem [shape: f32[16,1], index: 2, kind: input, shape index: {}]   ;;  %s872_s3 = inlined_call_operand.vmem [shape: bf16[2,16,8], index: 3, kind: input, shape index: {}]   ;;  %s873_s0 = inlined_call_operand.vmem [shape: bf16[2,16,8], index: 0, kind: input, shape index: {}]   ;;  %s874_s1 = inlined_call_operand.vmem [shape: bf16[2,16,8], index: 1, kind: input, shape index: {}]   ;;  %s875_s4 = inlined_call_operand.vmem [shape: bf16[3,16,8], index: 4, kind: input, shape index: {}]   ;;  %s876_s5 = inlined_call_operand.vmem [shape: f32[1,8], index: 5, kind: input, shape index: {}]   ;;  %s877_s6 = inlined_call_operand.vmem [shape: f32[1,8], index: 6, kind: input, shape index: {}]   ;;  %s878_s7 = inlined_call_operand.vmem [shape: f32[32,8], index: 7, kind: output, shape index: {}]  }
   0x1   :  { %674 = vset.pattern.permute.xlu0 %v682_v0  ;;  %v35_v1 = vld [vmem:[%s871_s2] sm:$0xff]  ;;  %v36_v2 = vld [vmem:[%s871_s2 + $0x8] sm:$0xff]  ;;  %28 = vst.msk [vmem:[#allocation2] sm:$0xf] %vm27_vm0, %v682_v0  ;;  %32 = vst.msk [vmem:[#allocation2 + $0xc] sm:$0xf] %vm27_vm0, %v682_v0 }
   0x2   :  { %59 = vperm.xlu0 %674, %v35_v1   ;;  %v77_v3 = vld [vmem:[%s872_s3] sm:$0xf]  ;;  %v79_v4 = vld [vmem:[%s872_s3 + $0x8] sm:$0xf]  ;;  %29 = vst.msk [vmem:[#allocation2 + $0x4] sm:$0xf] %vm27_vm0, %v682_v0  ;;  %vm126_vm3 = vmand %vm124_vm1, %vm125_vm2 }
   0x3   :  { %33 = vst.msk [vmem:[#allocation2 + $0x10] sm:$0xf] %vm27_vm0, %v682_v0  ;;  %v85_v5 = vshrl.u32 %v77_v3, 16  ;;  %v88_v6 = vshll.u32 %v77_v3, 16  ;;  %v102_v7 = vshrl.u32 %v79_v4, 16  ;;  %v105_v8 = vshll.u32 %v79_v4, 16 }
   0x4   :  { %vm30_vm4 = vcmask 122880   ;;  %v628_v17 = vld [vmem:[%s873_s0] sm:$0xff]   ;;  %v643_v19 = vld [vmem:[%s873_s0 + $0x8] sm:$0xff]   ;;  %vm132_vm5 = vcmask 57344   ;;  %vm81_vm6 = vsmask.f32 256 }
   0x5   :  { %v87_v9 = vrot.slane %v85_v5, 7  ;;  %v736_v10 = vrot.slane %v102_v7, 7  ;;  %31 = vst.msk [vmem:[#allocation2 + $0x8] sm:$0x1] %vm30_vm4, %v682_v0  ;;  %34 = vst.msk [vmem:[#allocation2 + $0x14] sm:$0x1] %vm30_vm4, %v682_v0  ;;  %v629_v24 = vunpack.c.l.bf16 %v628_v17  ;;  %v633_v25 = vunpack.c.l.bf16 %v643_v19 }
   0x6   :  { %64 = vperm.xlu0 %674, %v36_v2   ;;  %v78_v18 = vld [vmem:[%s872_s3 + $0x4] sm:$0xf]  ;;  %v644_v21 = vld [vmem:[%s874_s1 + $0x8] sm:$0xff]   ;;  %vm757_vm7 = vmand %vm132_vm5, %vm81_vm6  ;;  %v630_v31 = vunpack.c.h.bf16 %v628_v17  ;;  %v634_v36 = vunpack.c.h.bf16 %v643_v19  ;;  %vm82_vm8 = vsmask.f32 4368  ;;  %vm206_vm10 = vcmask 126016  }
   0x7   :  { %v90_v11 = vor.u32 %v88_v6, %v87_v9  ;;  %v107_v12 = vor.u32 %v105_v8, %v736_v10  ;;  %v636_v20 = vld [vmem:[%s874_s1] sm:$0xff]   ;;  %v93_v22 = vshrl.u32 %v78_v18, 16  ;;  %v641_v27 = vunpack.c.l.bf16 %v644_v21  ;;  %v80_v38 = vld [vmem:[%s872_s3 + $0xc] sm:$0xf]  ;;  %vm767_vm9 = vmor %vm81_vm6, %vm82_vm8  ;;  %s683_s3 = smov 8  }
   0x8   :  { %v127_v13 = vld [vmem:[#allocation2] sm:$0xf]  ;;  %v137_v14 = vld [vmem:[#allocation2 + $0xc] sm:$0xf]  ;;  %v637_v26 = vunpack.c.l.bf16 %v636_v20  ;;  %v638_v32 = vunpack.c.h.bf16 %v636_v20  ;;  %v642_v37 = vunpack.c.h.bf16 %v644_v21  ;;  %v110_v39 = vshrl.u32 %v80_v38, 16  ;;  %vm207_vm11 = vmand %vm206_vm10, %vm125_vm2 }
   0x9   :  { %v128_v15 = vsel %vm126_vm3, %v90_v11, %v127_v13  ;;  %v138_v16 = vsel %vm126_vm3, %v107_v12, %v137_v14  ;;  %v95_v23 = vrot.slane %v93_v22, 7  ;;  %v55_v35 = vsub.f32 %v641_v27, %v633_v25  ;;  %v675_v22 = vld [vmem:[%s875_s4] sm:$0xff]  }
   0xa   :  { %139 = vst [vmem:[#allocation2 + $0xc] sm:$0xf] %v138_v16  ;;  %129 = vst [vmem:[#allocation2] sm:$0xf] %v128_v15  ;;  %v53_v34 = vsub.f32 %v637_v26, %v629_v24  ;;  %v54_v41 = vsub.f32 %v638_v32, %v630_v31  ;;  %v96_v42 = vshll.u32 %v78_v18, 16  ;;  %v56_v45 = vsub.f32 %v642_v37, %v634_v36  ;;  %v678_v26 = vld [vmem:[%s875_s4 + $0x8] sm:$0xff]  }
   0xb   :  { %v100_v29 = vrot.slane %v95_v23, 4  ;;  %v112_v46 = vrot.slane %v110_v39, 7  ;;  %v91_v47 = vrot.slane %v87_v9, 4  ;;  %v113_v55 = vshll.u32 %v80_v38, 16  ;;  %660 = vmatprep.subr.bf16.mxu1 %v675_v22  ;;  %654 = vmatprep.subr.bf16.mxu0 %v678_v26 }
   0xc   :  { %v134_v30 = vld [vmem:[#allocation2 + $0x8] sm:$0x1]  ;;  %v98_v48 = vor.u32 %v96_v42, %v95_v23  ;;  %v141_v56 = vld [vmem:[#allocation2 + $0x14] sm:$0x1]  ;;  %v108_v61 = vrot.slane %v736_v10, 4  ;;  %661 = vmatpush3.bf16.msra.mxu1 %v675_v22  ;;  %655 = vmatpush3.bf16.msra.mxu0 %v678_v26  ;;  %vm213_vm12 = vcmask 122944  }
   0xd   :  { %v135_v33 = vsel %vm757_vm7, %v100_v29, %v134_v30  ;;  %v117_v52 = vrot.slane %v112_v46, 4  ;;  %v115_v62 = vor.u32 %v113_v55, %v112_v46  ;;  %v793_v29 = vld [vmem:[%s875_s4 + $0x10] sm:$0xff]   ;;  %vm799_vm13 = vmand %vm213_vm12, %vm81_vm6  ;;  %vm299_vm14 = vcmask 130048  }
   0xe   :  { %136 = vst [vmem:[#allocation2 + $0x8] sm:$0x1] %v135_v33  ;;  %v99_v54 = vsel %vm767_vm9, %v91_v47, %v98_v48  ;;  %666 = vmatprep.subr.bf16.mxu0 %v793_v29  ;;  %vm233_vm15 = vsmask.f32 3328  ;;  %vm234_vm0 = vsmask.f32 7440 }
   0xf   :  { %131 = vst.msk [vmem:[#allocation2 + $0x4] sm:$0xf] %vm124_vm1, %v99_v54  ;;  %v142_v63 = vsel %vm757_vm7, %v117_v52, %v141_v56  ;;  %v116_v4 = vsel %vm767_vm9, %v108_v61, %v115_v62  ;;  %vm432_vm2 = vcmask 1042432   ;;  %vm433_vm3 = vcmask 1046532  }
  0x10   :  { %143 = vst [vmem:[#allocation2 + $0x14] sm:$0x1] %v142_v63  ;;  %140 = vst.msk [vmem:[#allocation2 + $0x10] sm:$0xf] %vm124_vm1, %v116_v4  ;;  %vm523_vm5 = vcmask 64512  }
  0x11   :  { %v218_v30 = vld [vmem:[#allocation2 + $0xc] sm:$0xf]  ;;  %vm812_vm1 = vmor %vm233_vm15, %vm234_vm0 }
  0x12   :  { %vm820_vm4 = vmor %vm432_vm2, %vm433_vm3 }
  0x15   :  { %v215_v37 = vld [vmem:[#allocation2 + $0x8] sm:$0x1] }
  0x7d   :  { %v60_v40 = vpop.permute.xlu0 %59 }
  0x7e   :  { %v67_v43 = vmul.f32 %v60_v40, %v53_v34  ;;  %v69_v44 = vmul.f32 %v60_v40, %v55_v35 }
  0x80   :  { %v71_v49 = vadd.f32 %v629_v24, %v67_v43  ;;  %v73_v50 = vadd.f32 %v633_v25, %v69_v44  ;;  %v222_v44 = vld [vmem:[#allocation2 + $0x14] sm:$0x1] }
  0x81   :  { %v65_v53 = vpop.permute.xlu0 %64 }
  0x82   :  { %v623_v57 = vpack.c.bf16 %v71_v49, %v71_v49  ;;  %v625_v58 = vpack.c.bf16 %v73_v50, %v73_v50  ;;  %v68_v59 = vmul.f32 %v65_v53, %v54_v41  ;;  %v70_v60 = vmul.f32 %v65_v53, %v56_v45 }
  0x84   :  { %v172_v0 = vshrl.u32 %v625_v58, 16  ;;  %v72_v1 = vadd.f32 %v630_v31, %v68_v59  ;;  %v74_v2 = vadd.f32 %v634_v36, %v70_v60  ;;  %v155_v3 = vshrl.u32 %v623_v57, 16  ;;  %v208_v31 = vld [vmem:[#allocation2] sm:$0xf] }
  0x85   :  { %v175_v8 = vshll.u32 %v625_v58, 16  ;;  %v158_v10 = vshll.u32 %v623_v57, 16 }
  0x86   :  { %v624_v5 = vpack.c.bf16 %v72_v1, %v72_v1  ;;  %v626_v6 = vpack.c.bf16 %v74_v2, %v74_v2  ;;  %v174_v7 = vrot.slane %v172_v0, 7  ;;  %v157_v9 = vrot.slane %v155_v3, 7 }
  0x88   :  { %v163_v11 = vshrl.u32 %v624_v5, 16  ;;  %v180_v12 = vshrl.u32 %v626_v6, 16  ;;  %v177_v13 = vor.u32 %v175_v8, %v174_v7  ;;  %v160_v14 = vor.u32 %v158_v10, %v157_v9 }
  0x89   :  { %v166_v15 = vshll.u32 %v624_v5, 16  ;;  %v183_v18 = vshll.u32 %v626_v6, 16  ;;  %v161_v19 = vrot.slane %v157_v9, 4  ;;  %v178_v25 = vrot.slane %v174_v7, 4 }
  0x8a   :  { %v182_v16 = vrot.slane %v180_v12, 7  ;;  %v165_v17 = vrot.slane %v163_v11, 7  ;;  %194 = vrot.lane.b32.xlu0 %v177_v13, %s683_s3  ;;  %188 = vrot.lane.b32.xlu1 %v160_v14, %s683_s3 }
  0x8c   :  { %v170_v20 = vrot.slane %v165_v17, 4  ;;  %v168_v21 = vor.u32 %v166_v15, %v165_v17  ;;  %v185_v24 = vor.u32 %v183_v18, %v182_v16  ;;  %v187_v28 = vrot.slane %v182_v16, 4 }
  0x8e   :  { %v169_v23 = vsel %vm767_vm9, %v161_v19, %v168_v21  ;;  %192 = vrot.lane.b32.xlu0 %v170_v20, %s683_s3  ;;  %v186_v27 = vsel %vm767_vm9, %v178_v25, %v185_v24 }
  0x8f   :  { %190 = vrot.lane.b32.xlu1 %v169_v23, %s683_s3 }
  0x93   :  { %196 = vrot.lane.b32.xlu1 %v186_v27, %s683_s3 }
  0x97   :  { %198 = vrot.lane.b32.xlu1 %v187_v28, %s683_s3 }
  0xfc   :  { %v195_v32 = vpop.permute.xlu0 %194  ;;  %v189_v33 = vpop.permute.xlu1 %188 }
  0xfd   :  { %v219_v34 = vsel %vm207_vm11, %v195_v32, %v218_v30  ;;  %v209_v35 = vsel %vm207_vm11, %v189_v33, %v208_v31 }
  0xfe   :  { %220 = vst [vmem:[#allocation2 + $0xc] sm:$0xf] %v219_v34  ;;  %210 = vst [vmem:[#allocation2] sm:$0xf] %v209_v35 }
 0x100   :  { %v193_v38 = vpop.permute.xlu0 %192 }
 0x101   :  { %v191_v39 = vpop.permute.xlu1 %190  ;;  %v216_v40 = vsel %vm799_vm13, %v193_v38, %v215_v37 }
 0x102   :  { %212 = vst.msk [vmem:[#allocation2 + $0x4] sm:$0xf] %vm206_vm10, %v191_v39  ;;  %217 = vst [vmem:[#allocation2 + $0x8] sm:$0x1] %v216_v40 }
 0x105   :  { %v197_v41 = vpop.permute.xlu1 %196  ;;  %v225_v42 = vld [vmem:[#allocation2] sm:$0xf]  ;;  %v227_v43 = vld [vmem:[#allocation2 + $0xc] sm:$0xf] }
 0x106   :  { %221 = vst.msk [vmem:[#allocation2 + $0x10] sm:$0xf] %vm206_vm10, %v197_v41  ;;  %v237_v45 = vshrl.u32 %v225_v42, 16  ;;  %v240_v46 = vshll.u32 %v225_v42, 16  ;;  %v261_v51 = vshrl.u32 %v227_v43, 16  ;;  %v264_v52 = vshll.u32 %v227_v43, 16 }
 0x107   :  { %v426_v19 = vld [vmem:[#allocation2] sm:$0xe]  ;;  %v427_v36 = vld [vmem:[#allocation2 + $0xc] sm:$0xe] }
 0x108   :  { %v239_v49 = vrot.slane %v237_v45, 4  ;;  %v242_v50 = vrot.slane %v240_v46, 5  ;;  %v263_v61 = vrot.slane %v261_v51, 4  ;;  %v266_v62 = vrot.slane %v264_v52, 5 }
 0x109   :  { %v199_v47 = vpop.permute.xlu1 %198  ;;  %v226_v48 = vld [vmem:[#allocation2 + $0x4] sm:$0xf]  ;;  %v231_v56 = vld [vmem:[#allocation2 + $0x8] sm:$0x1]  ;;  %v614_v26 = vrot.slane %v426_v19, 9  ;;  %v615_v38 = vrot.slane %v427_v36, 9 }
 0x10a   :  { %v223_v53 = vsel %vm799_vm13, %v199_v47, %v222_v44  ;;  %v250_v54 = vshrl.u32 %v226_v48, 16  ;;  %v609_v55 = vcombine.low %v225_v42, %v226_v48  ;;  %v243_v57 = vor.u32 %v242_v50, %v239_v49  ;;  %v559_v36 = vld [vmem:[%s876_s5] sm:$0x1] }
 0x10b   :  { %224 = vst [vmem:[#allocation2 + $0x14] sm:$0x1] %v223_v53  ;;  %v246_v58 = vshll.u32 %v226_v48, 16  ;;  %v256_v0 = vshll.u32 %v231_v56, 16  ;;  %v437_v1 = vrot.slane %v226_v48, 5  ;;  %v267_v11 = vor.u32 %v266_v62, %v263_v61 }
 0x10c   :  { %662 = vmatprep.mubr.msk.bf16.mxu1 %vm299_vm14, %v609_v55  ;;  %v252_v59 = vrot.slane %v250_v54, 4  ;;  %v244_v4 = vrot.slane %v243_v57, 4  ;;  %v440_v21 = vrot.slane %v231_v56, 5 }
 0x10d   :  { %v228_v60 = vld [vmem:[#allocation2 + $0x10] sm:$0xf]  ;;  %v248_v63 = vrot.slane %v246_v58, 5  ;;  %v258_v10 = vrot.slane %v256_v0, 5  ;;  %v439_v13 = vrot.slane %v437_v1, 4  ;;  %v268_v22 = vrot.slane %v267_v11, 4 }
 0x10e   :  { %v274_v2 = vshrl.u32 %v228_v60, 16  ;;  %v610_v3 = vcombine.low %v227_v43, %v228_v60  ;;  %v270_v6 = vshll.u32 %v228_v60, 16  ;;  %v444_v28 = vrot.slane %v228_v60, 5 }
 0x10f   :  { %v253_v5 = vor.u32 %v252_v59, %v248_v63  ;;  %v249_v15 = vsel %vm812_vm1, %v244_v4, %v248_v63  ;;  %v441_v27 = vsel %vm820_vm4, %v439_v13, %v440_v21  ;;  %v438_v33 = vsel %vm820_vm4, %v614_v26, %v437_v1 }
 0x110   :  { %663 = vmatmul.mubr.msk.bf16.vlgmr.msra.gmra.mxu1 %vm299_vm14, %v610_v3  ;;  %v276_v8 = vrot.slane %v274_v2, 4  ;;  %v272_v12 = vrot.slane %v270_v6, 5  ;;  %v618_v35 = vcombine.low %v438_v33, %v441_v27  ;;  %v446_v37 = vrot.slane %v444_v28, 4 }
 0x111   :  { %v254_v9 = vrot.slane %v253_v5, 4  ;;  %v445_v40 = vsel %vm820_vm4, %v615_v38, %v444_v28 }
 0x112   :  { %v232_v14 = vld [vmem:[#allocation2 + $0x14] sm:$0x1]  ;;  %v277_v17 = vor.u32 %v276_v8, %v272_v12  ;;  %v273_v30 = vsel %vm812_vm1, %v268_v22, %v272_v12 }
 0x113   :  { %v259_v16 = vsel %vm812_vm1, %v254_v9, %v258_v10  ;;  %v280_v18 = vshll.u32 %v232_v14, 16  ;;  %v447_v34 = vrot.slane %v232_v14, 5 }
 0x114   :  { %v604_v20 = vcombine.low %v249_v15, %v259_v16  ;;  %v278_v23 = vrot.slane %v277_v17, 4 }
 0x115   :  { %v282_v24 = vrot.slane %v280_v18, 5  ;;  %v448_v39 = vsel %vm820_vm4, %v446_v37, %v447_v34  ;;  %v567_v34 = vlaneseq }
 0x116   :  { %656 = vmatprep.mubr.msk.bf16.mxu0 %vm299_vm14, %v604_v20  ;;  %v619_v41 = vcombine.low %v445_v40, %v448_v39  ;;  %v563_v40 = vld [vmem:[%s877_s6] sm:$0x1] }
 0x117   :  { %v283_v31 = vsel %vm812_vm1, %v278_v23, %v282_v24 }
 0x118   :  { %v605_v32 = vcombine.low %v273_v30, %v283_v31 }
 0x11a   :  { %657 = vmatmul.mubr.msk.bf16.vlgmr.msra.gmra.mxu0 %vm299_vm14, %v605_v32 }
 0x11b   :  { %667 = vmatpush3.bf16.msra.mxu0 %v793_v29  ;;  %668 = vmatprep.mubr.msk.bf16.mxu0 %vm299_vm14, %v618_v35  ;;  %v568_v35 = vshrl.u32 %v567_v34, 7 }
 0x11d   :  { %v569_v37 = vsub.s32 0, %v568_v35 }
 0x122   :  { %669 = vmatmul.mubr.msk.bf16.vlgmr.msra.gmra.mxu0 %vm299_vm14, %v619_v41 }
 0x1d0   :  { %v664_v42 = vpop.f32.mrf.mxu1 }
 0x1d2   :  { %v411_v45 = vpop.f32.mrf.mxu1 }
 0x1d4   :  { %v665_v29 = vpop.f32.mrf.mxu1 }
 0x1d6   :  { %v414_v53 = vpop.f32.mrf.mxu1 }
 0x1da   :  { %v658_v43 = vpop.f32.mrf.mxu0 }
 0x1db   :  { %v420_v51 = vadd.f32 %v664_v42, %v658_v43 }
 0x1dc   :  { %v340_v44 = vpop.f32.mrf.mxu0 }
 0x1dd   :  { %v412_v49 = vadd.f32 %v411_v45, %v340_v44 }
 0x1de   :  { %v659_v46 = vpop.f32.mrf.mxu0 }
 0x1df   :  { %v423_v55 = vadd.f32 %v665_v29, %v659_v46 }
 0x1e0   :  { %v343_v47 = vpop.f32.mrf.mxu0 }
 0x1e1   :  { %v415_v56 = vadd.f32 %v414_v53, %v343_v47 }
 0x1e2   :  { %v670_v48 = vpop.f32.mrf.mxu0 }
 0x1e3   :  { %v521_v57 = vadd.f32 %v670_v48, %v420_v51 }
 0x1e4   :  { %v504_v50 = vpop.f32.mrf.mxu0 }
 0x1e5   :  { %v519_v52 = vadd.f32 %v504_v50, %v412_v49  ;;  %v539_v62 = vmul.f32 %v521_v57, %v521_v57  ;;  %v527_v3 = vsel %vm523_vm5, %v521_v57, 0.0 }
 0x1e6   :  { %v671_v54 = vpop.f32.mrf.mxu0 }
 0x1e7   :  { %v537_v59 = vmul.f32 %v519_v52, %v519_v52  ;;  %v522_v60 = vadd.f32 %v671_v54, %v423_v55  ;;  %v524_v63 = vsel %vm523_vm5, %v519_v52, 0.0  ;;  %v544_v9 = vsel %vm523_vm5, %v539_v62, 0.0 }
 0x1e8   :  { %v507_v58 = vpop.f32.mrf.mxu0 }
 0x1e9   :  { %v520_v61 = vadd.f32 %v507_v58, %v415_v56  ;;  %v541_v4 = vsel %vm523_vm5, %v537_v59, 0.0  ;;  %v540_v5 = vmul.f32 %v522_v60, %v522_v60  ;;  %v529_v10 = vsel %vm523_vm5, %v522_v60, 0.0 }
 0x1eb   :  { %v525_v0 = vsel %vm523_vm5, %v520_v61, 0.0  ;;  %v538_v1 = vmul.f32 %v520_v61, %v520_v61  ;;  %v546_v13 = vsel %vm523_vm5, %v540_v5, 0.0 }
 0x1ec   :  { %v526_v2 = vadd.f32 %v525_v0, %v524_v63 }
 0x1ed   :  { %v542_v6 = vsel %vm523_vm5, %v538_v1, 0.0 }
 0x1ee   :  { %v528_v7 = vadd.f32 %v527_v3, %v526_v2  ;;  %v543_v8 = vadd.f32 %v542_v6, %v541_v4 }
 0x1f0   :  { %v530_v11 = vadd.f32 %v529_v10, %v528_v7  ;;  %v545_v12 = vadd.f32 %v544_v9, %v543_v8 }
 0x1f2   :  { %v531_v14 = vrot.slane %v530_v11, 4  ;;  %v547_v15 = vadd.f32 %v546_v13, %v545_v12 }
 0x1f4   :  { %v532_v16 = vadd.f32 %v531_v14, %v530_v11  ;;  %v548_v17 = vrot.slane %v547_v15, 4 }
 0x1f6   :  { %v533_v18 = vrot.slane %v532_v16, 2  ;;  %v549_v19 = vadd.f32 %v548_v17, %v547_v15 }
 0x1f8   :  { %v534_v20 = vadd.f32 %v533_v18, %v532_v16  ;;  %v550_v21 = vrot.slane %v549_v19, 2 }
 0x1fa   :  { %v535_v22 = vrot.slane %v534_v20, 1  ;;  %v551_v23 = vadd.f32 %v550_v21, %v549_v19 }
 0x1fc   :  { %v536_v24 = vadd.f32 %v535_v22, %v534_v20  ;;  %v552_v25 = vrot.slane %v551_v23, 1 }
 0x1fe   :  { %v553_v26 = vadd.f32 %v552_v25, %v551_v23  ;;  %v554_v27 = vmul.f32 0.03125, %v536_v24 }
 0x200   :  { %v555_v28 = vmul.f32 0.03125, %v553_v26  ;;  %v556_v30 = vmul.f32 %v554_v27, %v554_v27 }
 0x202   :  { %v557_v31 = vsub.f32 %v555_v28, %v556_v30 }
 0x204   :  { %v558_v32 = vmax.f32 %v557_v31, 0.0 }
 0x206   :  { %v560_v33 = vadd.f32 1e-05, %v558_v32 }
 0x208   :  { %680 = vrsqrt.f32 %v560_v33 }
 0x215   :  { %v681_v38 = vpop.eup %680 }
 0x216   :  { %v562_v39 = vmul.f32 %v681_v38, %v559_v36 }
 0x218   :  { %v564_v41 = vmul.f32 %v562_v39, %v554_v27  ;;  %v570_v42 = vrot.slane %v562_v39, %v569_v37 }
 0x21a   :  { %v565_v43 = vsub.f32 %v563_v40, %v564_v41  ;;  %v572_v44 = vmul.f32 %v570_v42, %v519_v52  ;;  %v573_v45 = vmul.f32 %v570_v42, %v520_v61  ;;  %v574_v46 = vmul.f32 %v570_v42, %v521_v57 }
 0x21b   :  { %v575_v47 = vmul.f32 %v570_v42, %v522_v60 }
 0x21c   :  { %v580_v29 = vrot.slane %v565_v43, %v569_v37 }
 0x21e   :  { %v582_v48 = vadd.f32 %v580_v29, %v572_v44  ;;  %v583_v49 = vadd.f32 %v580_v29, %v573_v45  ;;  %v584_v50 = vadd.f32 %v580_v29, %v574_v46  ;;  %v585_v51 = vadd.f32 %v580_v29, %v575_v47 }
 0x220   :  { %v586_v53 = vmax.f32 %v582_v48, 0.0  ;;  %v587_v54 = vmax.f32 %v583_v49, 0.0  ;;  %v588_v55 = vmax.f32 %v584_v50, 0.0  ;;  %v589_v56 = vmax.f32 %v585_v51, 0.0 }
 0x222   :  { %590 = vst.msk [vmem:[%s878_s7] sm:$0xff] %vm523_vm5, %v586_v53  ;;  %591 = vst.msk [vmem:[%s878_s7 + $0x8] sm:$0xff] %vm523_vm5, %v587_v54 }
 0x223   :  { %592 = vst.msk [vmem:[%s878_s7 + $0x10] sm:$0xff] %vm523_vm5, %v588_v55  ;;  %593 = vst.msk [vmem:[%s878_s7 + $0x18] sm:$0xff] %vm523_vm5, %v589_v56 }

</bundles_post_ra>
